<compile_context>
chip_gen: v6e
topology: v6e:2x2x1
jax: 0.10.0
libtpu: 0.0.40
codegen_flags: <defaults>
</compile_context>

<pallas_src>
import functools

import jax
import jax.numpy as jnp
from jax import lax
from jax.experimental import pallas as pl
from jax.experimental.pallas import tpu as pltpu


def _round_up(x, m):
    return ((x + m - 1) // m) * m


def _vmem_capacity_bytes():
    try:
        return int(pltpu.get_tpu_info().vmem_capacity_bytes)
    except Exception:
        return 64 * 1024 * 1024        # conservative fallback (v7x per-core VMEM)


def _choose_tb(B, S_pad, D2, gemm_itemsize):
    """Pick (TB, B_pad): batch-block size and padded batch.

    Budget accounts for the *double-buffered* enc block, the lane-dense
    (TB, S_pad) slabs and the f32 chunk intermediates (not just the raw enc
    bytes).  Target working set ~3/16 of physical VMEM (~12 MiB v7x, ~24 MiB
    v5e/v6e).  Prefer >= 2 grid steps so the enc DMA pipelines against compute
    and v7x can shard the parallel axis over both TensorCores.
    """
    cap = _vmem_capacity_bytes()
    budget = max(2 * 1024 * 1024, cap * 3 // 16)
    per_row = (2 * S_pad * D2 * gemm_itemsize      # double-buffered enc block
               + 6 * S_pad * 4                      # mask / attw / score slabs (+db)
               + 4 * 128 * D2 * 4                   # f32 GEMM / tanh chunk temps
               + 4 * D2 * 4)                        # dec / ctx rows (+db)
    fixed = 2 * D2 * D2 * gemm_itemsize + 2 * D2 * 4   # weight blocks
    max_tb = max(1, (budget - fixed) // per_row)

    if B <= 8:
        # Single block of the true batch: every block dim equals the full array
        # dim, so the (8,128) tiling rule is satisfied without padding.
        return B, B

    B_pad = _round_up(B, 8)
    cands = [tb for tb in range(8, B_pad + 1, 8)
             if B_pad % tb == 0 and tb <= max_tb]
    if not cands:
        return 8, B_pad
    multi = [tb for tb in cands if B_pad // tb >= 2]   # >=2 pipelined steps
    return (max(multi) if multi else max(cands)), B_pad


def _choose_chunk(TB, S_pad):
    """Sequence-axis chunk (multiple of 128 dividing S_pad) processed per inner
    step: targets ~512 flattened GEMM rows per MXU call while keeping the f32
    intermediates to one chunk instead of the whole (TB, S_pad, D2) block."""
    n_units = S_pad // 128
    want = max(1, -(-512 // max(1, TB * 128)))   # ceil(512 / (TB*128))
    best = 1
    for u in range(1, n_units + 1):
        if n_units % u == 0 and u <= want:
            best = u
    return best * 128


def attention_kernel(enc_ref, dec_ref, mask_ref, whT_ref, v_ref,
                     ctx_ref, attw_ref, score_sc, *, chunk):
    # enc_ref : (TB, S_pad, D2)  encoder_output block (gemm dtype, e.g. bf16)
    # dec_ref : (TB, D2)         precomputed Ws(s_t) + b (f32, hoisted)
    # mask_ref: (TB, S_pad)      padding mask, lane-dense (f32)
    # whT_ref : (D2, D2)         Wh.weight^T (gemm dtype)
    # v_ref   : (1, D2)          v.weight row (f32)
    # ctx_ref : (TB, D2)         context output (f32)
    # attw_ref: (TB, S_pad)      attention weights output, lane-dense (f32)
    # score_sc: (TB, S_pad)      f32 scratch for raw scores
    TB, S_pad, D2 = enc_ref.shape
    n_chunks = S_pad // chunk

    dec = dec_ref[...].astype(jnp.float32)[:, None, :]       # (TB, 1, D2)
    vrow = v_ref[...].astype(jnp.float32)[None, :, :]        # (1, 1, D2)
    whT = whT_ref[...]                                       # (D2, D2)

    # --- pass 1: scores, chunked along S so the f32 enc_feat/tanh temps never
    # exceed one (TB, chunk, D2) tile.  GEMM is over TB*chunk flattened rows.
    def score_chunk(start):
        enc_c = enc_ref[:, pl.ds(start, chunk), :]           # (TB, CH, D2)
        feat = jnp.dot(enc_c.reshape(TB * chunk, D2), whT,
                       preferred_element_type=jnp.float32
                       ).reshape(TB, chunk, D2)
        # TODO(synk): bf16 tanh (v6e/v7x EUP rate) only if EUP is the binding slot.
        sc = jnp.sum(jnp.tanh(feat + dec) * vrow, axis=-1)   # (TB, CH) f32
        score_sc[:, pl.ds(start, chunk)] = sc

    if n_chunks <= 4:
        for c in range(n_chunks):                            # static slices
            score_chunk(c * chunk)
    else:
        def body(c, carry):
            score_chunk(pl.multiple_of(c * chunk, chunk))
            return carry
        lax.fori_loop(0, n_chunks, body, 0)

    # --- fused masked softmax with one normalization (shift-invariant, so the
    # padded-S columns entering the max are harmless; mask zeroes them).
    score = score_sc[...]
    m = jnp.max(score, axis=-1, keepdims=True)               # (TB, 1)
    w = jnp.exp(score - m) * mask_ref[...]                   # (TB, S_pad)
    denom = jnp.sum(w, axis=-1, keepdims=True)               # (TB, 1)
    w = w * pl.reciprocal(denom, approx=False)               # exact: weights sum to 1
    attw_ref[...] = w.astype(attw_ref.dtype)

    # --- pass 2: context vector on the VPU (no q=1 MXU matmuls), chunked over
    # the same S tiles while the enc block is resident in VMEM.
    def ctx_chunk(start):
        enc_c = enc_ref[:, pl.ds(start, chunk), :].astype(jnp.float32)
        w_c = attw_ref[:, pl.ds(start, chunk)]               # (TB, CH)
        return jnp.sum(w_c[:, :, None] * enc_c, axis=1)      # (TB, D2)

    if n_chunks <= 4:
        ctx = ctx_chunk(0)
        for c in range(1, n_chunks):
            ctx = ctx + ctx_chunk(c * chunk)
    else:
        def ctx_body(c, acc):
            return acc + ctx_chunk(pl.multiple_of(c * chunk, chunk))
        ctx = lax.fori_loop(0, n_chunks, ctx_body,
                            jnp.zeros((TB, D2), jnp.float32))
    ctx_ref[...] = ctx.astype(ctx_ref.dtype)


def attention_forward(decoder_states, encoder_output, x_padding_masks, params,
                      *, gemm_dtype=jnp.bfloat16):
    """Pallas-backed forward identical to the PyTorch Attention module.

    decoder_states: (h_dec, c_dec), each (1, B, H)
    encoder_output: (B, S, 2H)
    x_padding_masks: (B, S)
    params: dict with 'Wh_w' (2H,2H), 'Ws_w' (2H,2H), 'Ws_b' (2H,), 'v_w' (1,2H)
    returns (context_vector (B, 2H), att_weights (B, S))
    """
    h_dec, c_dec = decoder_states
    B, S, D2 = encoder_output.shape                    # D2 = 2 * hidden_size
    f32 = jnp.float32
    gi = jnp.dtype(gemm_dtype).itemsize

    # Hoisted decoder projection: one XLA (B, 2H) @ (2H, 2H) GEMM for all rows
    # (no M=1 matmul inside the kernel, Ws never enters VMEM).
    s_t = jnp.concatenate([h_dec, c_dec], axis=2)[0]                   # (B, 2H)
    dec_feat = (s_t.astype(f32) @ params["Ws_w"].T.astype(f32)
                + params["Ws_b"].astype(f32))                          # (B, 2H)

    # Pad S to a lane-dense multiple of 128 and (for large batches) B to a
    # sublane-aligned multiple of 8.  Padded S columns get mask 0 (exact);
    # padded B rows get an all-ones mask so their denominator is nonzero.
    S_pad = _round_up(S, 128)
    TB, B_pad = _choose_tb(B, S_pad, D2, gi)
    chunk = _choose_chunk(TB, S_pad)

    enc_p = jnp.zeros((B_pad, S_pad, D2), gemm_dtype)
    enc_p = enc_p.at[:B, :S, :].set(encoder_output.astype(gemm_dtype))
    dec_p = jnp.zeros((B_pad, D2), f32).at[:B, :].set(dec_feat)
    mask_p = jnp.zeros((B_pad, S_pad), f32)
    mask_p = mask_p.at[:B, :S].set(x_padding_masks.astype(f32))
    if B_pad > B:
        mask_p = mask_p.at[B:, :].set(1.0)

    whT = params["Wh_w"].T.astype(gemm_dtype)                          # (2H, 2H)
    vrow = params["v_w"].astype(f32)                                   # (1, 2H)

    vmem_cap = _vmem_capacity_bytes()
    kernel = functools.partial(attention_kernel, chunk=chunk)

    ctx, attw = pl.pallas_call(
        kernel,
        out_shape=(
            jax.ShapeDtypeStruct((B_pad, D2), f32),                    # context
            jax.ShapeDtypeStruct((B_pad, S_pad), f32),                 # att_weights
        ),
        grid_spec=pltpu.PrefetchScalarGridSpec(
            num_scalar_prefetch=0,
            grid=(B_pad // TB,),
            in_specs=[
                pl.BlockSpec((TB, S_pad, D2), lambda b: (b, 0, 0)),    # encoder block
                pl.BlockSpec((TB, D2), lambda b: (b, 0)),              # dec_feat
                pl.BlockSpec((TB, S_pad), lambda b: (b, 0)),           # padding mask
                # Grid-invariant weight blocks.  Single-buffering them via
                # pipeline_mode=pl.Buffered(1) would save one Wh^T copy of VMEM;
                # left at the default for lowering portability (small win).
                pl.BlockSpec((D2, D2), lambda b: (0, 0)),              # Wh^T
                pl.BlockSpec((1, D2), lambda b: (0, 0)),               # v row
            ],
            out_specs=[
                pl.BlockSpec((TB, D2), lambda b: (b, 0)),
                pl.BlockSpec((TB, S_pad), lambda b: (b, 0)),
            ],
            scratch_shapes=[pltpu.VMEM((TB, S_pad), f32)],             # raw scores
        ),
        compiler_params=pltpu.CompilerParams(
            dimension_semantics=("parallel",),
            # Explicit scoped-VMEM limit (v5e default is only 16 MiB); ~3/4 of
            # physical capacity => 96 MiB on v5e/v6e, 48 MiB on v7x.
            vmem_limit_bytes=int(min(vmem_cap * 3 // 4, 100 * 1024 * 1024)),
        ),
    )(enc_p, dec_p, mask_p, whT, vrow)

    return ctx[:B, :], attw[:B, :S]


def attention_reference(decoder_states, encoder_output, x_padding_masks, params):
    """Pure-JAX reference mirroring the PyTorch forward, for verification."""
    h_dec, c_dec = decoder_states
    s_t = jnp.concatenate([h_dec, c_dec], axis=2).transpose(1, 0, 2)   # (B,1,2H)
    enc_feat = encoder_output @ params["Wh_w"].T
    dec_feat = s_t @ params["Ws_w"].T + params["Ws_b"]
    score = jnp.tanh(enc_feat + dec_feat) @ params["v_w"].T            # (B,S,1)
    att = jax.nn.softmax(score, axis=1)[..., 0]                        # (B,S)
    att = att * x_padding_masks
    att = att / jnp.sum(att, axis=1, keepdims=True)
    ctx = jnp.einsum("bs,bsd->bd", att, encoder_output)
    return ctx, att


if __name__ == "__main__":
    key = jax.random.PRNGKey(0)
    B, S, H = 2, 8, 16
    D2 = 2 * H

    keys = jax.random.split(key, 8)
    h_dec = jax.random.normal(keys[0], (1, B, H), jnp.float32)
    c_dec = jax.random.normal(keys[1], (1, B, H), jnp.float32)
    encoder_output = jax.random.normal(keys[2], (B, S, D2), jnp.float32)
    # padding mask: 1s with a few trailing zeros in one row
    x_padding_masks = jnp.ones((B, S), jnp.float32).at[1, S - 2:].set(0.0)

    # deterministic parameter init (shapes follow nn.Linear in __init__)
    scale = 1.0 / jnp.sqrt(jnp.float32(D2))
    params = {
        "Wh_w": jax.random.uniform(keys[3], (D2, D2), jnp.float32, -scale, scale),
        "Ws_w": jax.random.uniform(keys[4], (D2, D2), jnp.float32, -scale, scale),
        "Ws_b": jax.random.uniform(keys[5], (D2,), jnp.float32, -scale, scale),
        "v_w": jax.random.uniform(keys[6], (1, D2), jnp.float32, -scale, scale),
    }

    ctx_ref, attw_ref = attention_reference((h_dec, c_dec), encoder_output,
                                            x_padding_masks, params)

    # Default path: bf16 GEMM inputs, f32 accumulation (perf-review default).
    ctx, attw = attention_forward((h_dec, c_dec), encoder_output,
                                  x_padding_masks, params)
    ctx = jax.block_until_ready(ctx)
    attw = jax.block_until_ready(attw)
    assert ctx.shape == (B, D2) and attw.shape == (B, S)
    assert jnp.allclose(ctx, ctx_ref, atol=2e-2, rtol=2e-2)
    assert jnp.allclose(attw, attw_ref, atol=2e-2, rtol=2e-2)

    # f32 GEMM path for a tight numerical check of the kernel structure.
    ctx32, attw32 = attention_forward((h_dec, c_dec), encoder_output,
                                      x_padding_masks, params,
                                      gemm_dtype=jnp.float32)
    ctx32 = jax.block_until_ready(ctx32)
    attw32 = jax.block_until_ready(attw32)
    assert jnp.allclose(ctx32, ctx_ref, atol=2e-3, rtol=2e-3)
    assert jnp.allclose(attw32, attw_ref, atol=2e-3, rtol=2e-3)

    print("KERNEL_OK")
</pallas_src>

<mosaic_0001>
module attributes {stable_mosaic.version = 11 : i64} {
  func.func @attention_kernel(%arg0: i32, %arg1: memref<2x128x32xbf16, #tpu.memory_space<vmem>>, %arg2: memref<2x32xf32, #tpu.memory_space<vmem>>, %arg3: memref<2x128xf32, #tpu.memory_space<vmem>>, %arg4: memref<32x32xbf16, #tpu.memory_space<vmem>>, %arg5: memref<1x32xf32, #tpu.memory_space<vmem>>, %arg6: memref<2x32xf32, #tpu.memory_space<vmem>>, %arg7: memref<2x128xf32, #tpu.memory_space<vmem>>, %arg8: memref<2x128xf32, #tpu.memory_space<vmem>>) attributes {dimension_semantics = [#tpu.dimension_semantics<parallel>], iteration_bounds = array<i64: 1>, scalar_prefetch = 0 : i64, scratch_operands = 1 : i64, tpu.core_type = #tpu.core_type<tc>, window_params = [{transform_indices = @transform_0, window_bounds = array<i64: 2, 128, 32>}, {transform_indices = @transform_1, window_bounds = array<i64: 2, 32>}, {transform_indices = @transform_2, window_bounds = array<i64: 2, 128>}, {pipeline_mode = #tpu.pipeline_mode<synchronous>, transform_indices = @transform_3, window_bounds = array<i64: 32, 32>}, {pipeline_mode = #tpu.pipeline_mode<synchronous>, transform_indices = @transform_4, window_bounds = array<i64: 1, 32>}, {transform_indices = @transform_5, window_bounds = array<i64: 2, 32>}, {transform_indices = @transform_6, window_bounds = array<i64: 2, 128>}]} {
    %c0 = arith.constant 0 : index
    %c0_0 = arith.constant 0 : index
    %0 = vector.load %arg2[%c0, %c0_0] : memref<2x32xf32, #tpu.memory_space<vmem>>, vector<2x32xf32>
    %1 = vector.shape_cast %0 : vector<2x32xf32> to vector<2x1x32xf32>
    %c0_1 = arith.constant 0 : index
    %c0_2 = arith.constant 0 : index
    %2 = vector.load %arg5[%c0_1, %c0_2] : memref<1x32xf32, #tpu.memory_space<vmem>>, vector<1x32xf32>
    %3 = vector.shape_cast %2 : vector<1x32xf32> to vector<1x1x32xf32>
    %c0_3 = arith.constant 0 : index
    %c0_4 = arith.constant 0 : index
    %4 = vector.load %arg4[%c0_3, %c0_4] : memref<32x32xbf16, #tpu.memory_space<vmem>>, vector<32x32xbf16>
    %c0_5 = arith.constant 0 : index
    %c0_6 = arith.constant 0 : index
    %c0_7 = arith.constant 0 : index
    %5 = vector.load %arg1[%c0_5, %c0_6, %c0_7] : memref<2x128x32xbf16, #tpu.memory_space<vmem>>, vector<2x128x32xbf16>
    %6 = vector.shape_cast %5 : vector<2x128x32xbf16> to vector<256x32xbf16>
    %cst = arith.constant dense<0.000000e+00> : vector<256x32xf32>
    %7 = tpu.matmul %6, %4, %cst {dimension_numbers = #tpu.dot_dimension_numbers<[1], [0], [0], [1], [0, 0, 1, 1], [], []>} : vector<256x32xbf16>, vector<32x32xbf16>, vector<256x32xf32> -> vector<256x32xf32>
    %8 = vector.shape_cast %7 : vector<256x32xf32> to vector<2x128x32xf32>
    %9 = vector.broadcast %1 : vector<2x1x32xf32> to vector<2x128x32xf32>
    %10 = arith.addf %8, %9 : vector<2x128x32xf32>
    %11 = math.tanh %10 : vector<2x128x32xf32>
    %12 = vector.broadcast %3 : vector<1x1x32xf32> to vector<2x128x32xf32>
    %13 = arith.mulf %11, %12 : vector<2x128x32xf32>
    %cst_8 = arith.constant dense<0.000000e+00> : vector<2x128xf32>
    %14 = vector.multi_reduction <add>, %13, %cst_8 [2] : vector<2x128x32xf32> to vector<2x128xf32>
    %c0_9 = arith.constant 0 : index
    %c0_10 = arith.constant 0 : index
    %15 = vector.load %arg8[%c0_9, %c0_10] : memref<2x128xf32, #tpu.memory_space<vmem>>, vector<2x128xf32>
    tpu.vector_store %arg8[%c0_9, %c0_10], %14 {strides = array<i32>} : memref<2x128xf32, #tpu.memory_space<vmem>>, vector<2x128xf32>,
    %c0_11 = arith.constant 0 : index
    %c0_12 = arith.constant 0 : index
    %16 = vector.load %arg8[%c0_11, %c0_12] : memref<2x128xf32, #tpu.memory_space<vmem>>, vector<2x128xf32>
    %cst_13 = arith.constant dense<0xFF800000> : vector<2xf32>
    %17 = vector.multi_reduction <maximumf>, %16, %cst_13 [1] : vector<2x128xf32> to vector<2xf32>
    %18 = vector.shape_cast %17 : vector<2xf32> to vector<2x1xf32>
    %19 = vector.broadcast %18 : vector<2x1xf32> to vector<2x128xf32>
    %20 = arith.subf %16, %19 : vector<2x128xf32>
    %21 = math.exp %20 : vector<2x128xf32>
    %c0_14 = arith.constant 0 : index
    %c0_15 = arith.constant 0 : index
    %22 = vector.load %arg3[%c0_14, %c0_15] : memref<2x128xf32, #tpu.memory_space<vmem>>, vector<2x128xf32>
    %23 = arith.mulf %21, %22 : vector<2x128xf32>
    %cst_16 = arith.constant dense<0.000000e+00> : vector<2xf32>
    %24 = vector.multi_reduction <add>, %23, %cst_16 [1] : vector<2x128xf32> to vector<2xf32>
    %25 = vector.shape_cast %24 : vector<2xf32> to vector<2x1xf32>
    %26 = tpu.reciprocal %25 : vector<2x1xf32> -> vector<2x1xf32>
    %27 = vector.broadcast %26 : vector<2x1xf32> to vector<2x128xf32>
    %28 = arith.mulf %23, %27 : vector<2x128xf32>
    %c0_17 = arith.constant 0 : index
    %c0_18 = arith.constant 0 : index
    %29 = vector.load %arg7[%c0_17, %c0_18] : memref<2x128xf32, #tpu.memory_space<vmem>>, vector<2x128xf32>
    tpu.vector_store %arg7[%c0_17, %c0_18], %28 {strides = array<i32>} : memref<2x128xf32, #tpu.memory_space<vmem>>, vector<2x128xf32>,
    %c0_19 = arith.constant 0 : index
    %c0_20 = arith.constant 0 : index
    %c0_21 = arith.constant 0 : index
    %30 = vector.load %arg1[%c0_19, %c0_20, %c0_21] : memref<2x128x32xbf16, #tpu.memory_space<vmem>>, vector<2x128x32xbf16>
    %31 = arith.extf %30 : vector<2x128x32xbf16> to vector<2x128x32xf32>
    %c0_22 = arith.constant 0 : index
    %c0_23 = arith.constant 0 : index
    %32 = vector.load %arg7[%c0_22, %c0_23] : memref<2x128xf32, #tpu.memory_space<vmem>>, vector<2x128xf32>
    %33 = vector.shape_cast %32 : vector<2x128xf32> to vector<2x128x1xf32>
    %34 = vector.broadcast %33 : vector<2x128x1xf32> to vector<2x128x32xf32>
    %35 = arith.mulf %34, %31 : vector<2x128x32xf32>
    %cst_24 = arith.constant dense<0.000000e+00> : vector<2x32xf32>
    %36 = vector.multi_reduction <add>, %35, %cst_24 [1] : vector<2x128x32xf32> to vector<2x32xf32>
    %c0_25 = arith.constant 0 : index
    %c0_26 = arith.constant 0 : index
    %37 = vector.load %arg6[%c0_25, %c0_26] : memref<2x32xf32, #tpu.memory_space<vmem>>, vector<2x32xf32>
    tpu.vector_store %arg6[%c0_25, %c0_26], %36 {strides = array<i32>} : memref<2x32xf32, #tpu.memory_space<vmem>>, vector<2x32xf32>,
    return
  }
  func.func @transform_0(%arg0: i32) -> (i32, i32, i32) {
    %c0_i32 = arith.constant 0 : i32
    %c0_i32_0 = arith.constant 0 : i32
    %c0_i32_1 = arith.constant 0 : i32
    return %arg0, %c0_i32, %c0_i32_0 : i32, i32, i32
  }
  func.func @transform_1(%arg0: i32) -> (i32, i32) {
    %c0_i32 = arith.constant 0 : i32
    %c0_i32_0 = arith.constant 0 : i32
    return %arg0, %c0_i32 : i32, i32
  }
  func.func @transform_2(%arg0: i32) -> (i32, i32) {
    %c0_i32 = arith.constant 0 : i32
    %c0_i32_0 = arith.constant 0 : i32
    return %arg0, %c0_i32 : i32, i32
  }
  func.func @transform_3(%arg0: i32) -> (i32, i32) {
    %c0_i32 = arith.constant 0 : i32
    %c0_i32_0 = arith.constant 0 : i32
    %c0_i32_1 = arith.constant 0 : i32
    return %c0_i32, %c0_i32_0 : i32, i32
  }
  func.func @transform_4(%arg0: i32) -> (i32, i32) {
    %c0_i32 = arith.constant 0 : i32
    %c0_i32_0 = arith.constant 0 : i32
    %c0_i32_1 = arith.constant 0 : i32
    return %c0_i32, %c0_i32_0 : i32, i32
  }
  func.func @transform_5(%arg0: i32) -> (i32, i32) {
    %c0_i32 = arith.constant 0 : i32
    %c0_i32_0 = arith.constant 0 : i32
    return %arg0, %c0_i32 : i32, i32
  }
  func.func @transform_6(%arg0: i32) -> (i32, i32) {
    %c0_i32 = arith.constant 0 : i32
    %c0_i32_0 = arith.constant 0 : i32
    return %arg0, %c0_i32 : i32, i32
  }
}

</mosaic_0001>

<bundles_post_ra>
// kernel: tpu_custom_call.1
= control target key start
LH: loop header
LB: loop body
LE: loop exit
PB: predicated region body
PF: predicated region fallthrough
CT: control target
= control target key end

     0   :  { %12 = vsyncpa [#allocation4], 0  ;;  %vm178_vm0 = vcmask 261120   ;;  %s1878_s0 = inlined_call_operand.vmem [shape: bf16[2,128,32], index: 0, kind: input, shape index: {}]   ;;  %s1879_s1 = inlined_call_operand.vmem [shape: f32[2,32], index: 1, kind: input, shape index: {}]   ;;  %s1880_s2 = inlined_call_operand.vmem [shape: f32[2,128], index: 2, kind: input, shape index: {}]   ;;  %s1881_s3 = inlined_call_operand.vmem [shape: bf16[32,32], index: 3, kind: input, shape index: {}]   ;;  %s1882_s4 = inlined_call_operand.vmem [shape: f32[1,32], index: 4, kind: input, shape index: {}]   ;;  %s1883_s5 = inlined_call_operand.hbm [shape: f32[2,32], index: 5, kind: output, shape index: {0}]   ;;  %s1884_s6 = inlined_call_operand.hbm [shape: f32[2,128], index: 6, kind: output, shape index: {1}]  }
   0x1   :  { %v1353_v0 = vld [vmem:[%s1881_s3 + $0x8] sm:$0xff]   ;;  %v1354_v1 = vld [vmem:[%s1881_s3] sm:$0xff]   ;;  %v1359_v6 = vld [vmem:[%s1878_s0 + $0x10] sm:$0xff]  }
   0x2   :  { %1310 = vmatprep.subr.bf16.mxu0 %v1353_v0  ;;  %1346 = vmatprep.subr.bf16.mxu1 %v1353_v0  ;;  %v1355_v2 = vld [vmem:[%s1878_s0] sm:$0xff]   ;;  %v1357_v4 = vld [vmem:[%s1878_s0 + $0x8] sm:$0xff]   ;;  %v1360_v7 = vld [vmem:[%s1878_s0 + $0x50] sm:$0xff]  }
   0x3   :  { %1311 = vmatpush3.bf16.msra.mxu0 %v1353_v0  ;;  %1348 = vmatpush3.bf16.msra.mxu1 %v1353_v0  ;;  %v1356_v3 = vld [vmem:[%s1878_s0 + $0x40] sm:$0xff]   ;;  %v1358_v5 = vld [vmem:[%s1878_s0 + $0x48] sm:$0xff]   ;;  %v1361_v8 = vld [vmem:[%s1878_s0 + $0x18] sm:$0xff]  }
   0x4   :  { %1312 = vmatprep.subr.bf16.mxu0 %v1354_v1  ;;  %1347 = vmatprep.subr.bf16.mxu1 %v1354_v1  ;;  %v1362_v9 = vld [vmem:[%s1878_s0 + $0x58] sm:$0xff]   ;;  %v1363_v10 = vld [vmem:[%s1878_s0 + $0x20] sm:$0xff]  }
   0x5   :  { %1314 = vmatprep.mubr.msk.bf16.mxu0 %vm178_vm0, %v1355_v2  ;;  %1330 = vmatprep.mubr.msk.bf16.mxu1 %vm178_vm0, %v1356_v3  ;;  %v1364_v11 = vld [vmem:[%s1878_s0 + $0x60] sm:$0xff]  }
   0x7   :  { %1313 = vmatpush3.bf16.msra.mxu0 %v1354_v1  ;;  %1349 = vmatpush3.bf16.msra.mxu1 %v1354_v1 }
   0xa   :  { %1315 = vmatmul.mubr.msk.bf16.vlgmr.msra.gmra.mxu0 %vm178_vm0, %v1357_v4  ;;  %1331 = vmatmul.mubr.msk.bf16.vlgmr.msra.gmra.mxu1 %vm178_vm0, %v1358_v5 }
   0xb   :  { %1318 = vmatprep.mubr.msk.bf16.mxu0 %vm178_vm0, %v1359_v6  ;;  %1334 = vmatprep.mubr.msk.bf16.mxu1 %vm178_vm0, %v1360_v7 }
  0x12   :  { %1319 = vmatmul.mubr.msk.bf16.gmra.mxu0 %vm178_vm0, %v1361_v8  ;;  %1335 = vmatmul.mubr.msk.bf16.gmra.mxu1 %vm178_vm0, %v1362_v9 }
  0x13   :  { %1322 = vmatprep.mubr.msk.bf16.mxu0 %vm178_vm0, %v1363_v10  ;;  %1338 = vmatprep.mubr.msk.bf16.mxu1 %vm178_vm0, %v1364_v11 }
  0x14   :  { %13 = vsyncpa [#allocation6], 0  ;;  %v1365_v12 = vld [vmem:[%s1878_s0 + $0x28] sm:$0xff]   ;;  %v1367_v14 = vld [vmem:[%s1878_s0 + $0x30] sm:$0xff]   ;;  %v1483_v18 = vmov 1966171168   ;;  %v38_v20 = vlaneseq }
  0x15   :  { %v1366_v13 = vld [vmem:[%s1878_s0 + $0x68] sm:$0xff]   ;;  %v1368_v15 = vld [vmem:[%s1878_s0 + $0x70] sm:$0xff]   ;;  %v1369_v16 = vld [vmem:[%s1878_s0 + $0x38] sm:$0xff]   ;;  %v36_v19 = vunpack.c.l.s4 %v1483_v18  ;;  %vm639_vm1 = vcmask 130112   ;;  %vm646_vm2 = vcmask 195712   ;;  %vm653_vm3 = vcmask 261312  }
  0x16   :  { %v1370_v17 = vld [vmem:[%s1878_s0 + $0x78] sm:$0xff]   ;;  %v1592_v22 = vshrl.u32 %v38_v20, 7  ;;  %v1177_v23 = vld.sshfl [vmem:[%s1879_s1] sm:$0x11 pattern:$0x75316420] }
  0x17   :  { %v37_v21 = vunpack.c.0.s8 %v36_v19  ;;  %v34_v25 = vcombine.high %v1177_v23, %v1177_v23  ;;  %v1620_v53 = vld [vmem:[%s1882_s4] ss:$0 sm:$0xff]  ;;  %vm660_vm4 = vcmask 326912   ;;  %vm667_vm5 = vcmask 392512  }
  0x18   :  { %v1599_v27 = vsub.s32 0, %v1592_v22  ;;  %vm674_vm6 = vcmask 458112   ;;  %vm681_vm7 = vcmask 523712   ;;  %vm688_vm8 = vcmask 589312  }
  0x19   :  { %v40_v24 = vsub.s32 %v37_v21, %v1592_v22  ;;  %vm695_vm9 = vcmask 654912   ;;  %vm702_vm10 = vcmask 720512   ;;  %vm709_vm11 = vcmask 786112  }
  0x1a   :  { %1323 = vmatmul.mubr.msk.bf16.gmra.mxu0 %vm178_vm0, %v1365_v12  ;;  %1339 = vmatmul.mubr.msk.bf16.gmra.mxu1 %vm178_vm0, %v1366_v13  ;;  %vm716_vm12 = vcmask 851712   ;;  %vm723_vm13 = vcmask 917312   ;;  %vm730_vm14 = vcmask 982912   ;;  %vm737_vm15 = vcmask 1048512  }
  0x1b   :  { %1326 = vmatprep.mubr.msk.bf16.mxu0 %vm178_vm0, %v1367_v14  ;;  %1342 = vmatprep.mubr.msk.bf16.mxu1 %vm178_vm0, %v1368_v15  ;;  %v41_v26 = vrot.slane %v1177_v23, %v40_v24  ;;  %v48_v28 = vrot.slane %v34_v25, %v40_v24 }
  0x1d   :  { %v1602_v29 = vrot.slane %v41_v26, %v1599_v27  ;;  %v1605_v30 = vrot.slane %v48_v28, %v1599_v27 }
  0x22   :  { %1327 = vmatmul.mubr.msk.bf16.gmra.mxu0 %vm178_vm0, %v1369_v16  ;;  %1343 = vmatmul.mubr.msk.bf16.gmra.mxu1 %vm178_vm0, %v1370_v17 }
  0xca   :  { %v1316_v31 = vpop.f32.mrf.mxu0  ;;  %v1332_v32 = vpop.f32.mrf.mxu1 }
  0xcb   :  { %v400_v33 = vadd.f32 %v1316_v31, %v1602_v29  ;;  %v416_v34 = vadd.f32 %v1332_v32, %v1605_v30 }
  0xcc   :  { %v261_v35 = vpop.f32.mrf.mxu0  ;;  %v325_v36 = vpop.f32.mrf.mxu1 }
  0xcd   :  { %1371 = vtanh.f32 %v400_v33  ;;  %v398_v37 = vadd.f32 %v1602_v29, %v261_v35  ;;  %v414_v38 = vadd.f32 %v1605_v30, %v325_v36 }
  0xce   :  { %1373 = vtanh.f32 %v416_v34  ;;  %v1317_v39 = vpop.f32.mrf.mxu0  ;;  %v1333_v40 = vpop.f32.mrf.mxu1 }
  0xcf   :  { %1375 = vtanh.f32 %v398_v37  ;;  %v401_v41 = vadd.f32 %v1317_v39, %v1602_v29  ;;  %v417_v42 = vadd.f32 %v1333_v40, %v1605_v30 }
  0xd0   :  { %1377 = vtanh.f32 %v414_v38  ;;  %v264_v43 = vpop.f32.mrf.mxu0  ;;  %v328_v44 = vpop.f32.mrf.mxu1 }
  0xd1   :  { %1379 = vtanh.f32 %v401_v41  ;;  %v399_v45 = vadd.f32 %v1602_v29, %v264_v43  ;;  %v415_v46 = vadd.f32 %v1605_v30, %v328_v44 }
  0xd2   :  { %1381 = vtanh.f32 %v417_v42  ;;  %v1320_v47 = vpop.f32.mrf.mxu0  ;;  %v1336_v49 = vpop.f32.mrf.mxu1 }
  0xd3   :  { %v404_v48 = vadd.f32 %v1320_v47, %v1602_v29  ;;  %v420_v50 = vadd.f32 %v1336_v49, %v1605_v30  ;;  %1383 = vtanh.f32 %v399_v45 }
  0xd4   :  { %1385 = vtanh.f32 %v415_v46  ;;  %v277_v51 = vpop.f32.mrf.mxu0  ;;  %v341_v52 = vpop.f32.mrf.mxu1 }
  0xd5   :  { %1387 = vtanh.f32 %v404_v48  ;;  %v402_v54 = vadd.f32 %v1602_v29, %v277_v51  ;;  %v418_v56 = vadd.f32 %v1605_v30, %v341_v52 }
  0xd6   :  { %1389 = vtanh.f32 %v420_v50  ;;  %v1321_v57 = vpop.f32.mrf.mxu0  ;;  %v1337_v59 = vpop.f32.mrf.mxu1 }
  0xd7   :  { %1391 = vtanh.f32 %v402_v54  ;;  %v405_v0 = vadd.f32 %v1321_v57, %v1602_v29  ;;  %v421_v4 = vadd.f32 %v1337_v59, %v1605_v30 }
  0xd8   :  { %1393 = vtanh.f32 %v418_v56  ;;  %v280_v5 = vpop.f32.mrf.mxu0  ;;  %v344_v9 = vpop.f32.mrf.mxu1 }
  0xd9   :  { %1395 = vtanh.f32 %v405_v0  ;;  %v403_v11 = vadd.f32 %v1602_v29, %v280_v5  ;;  %v419_v16 = vadd.f32 %v1605_v30, %v344_v9 }
  0xda   :  { %v1372_v55 = vpop.eup %1371  ;;  %v1324_v10 = vpop.f32.mrf.mxu0  ;;  %1397 = vtanh.f32 %v421_v4 }
  0xdb   :  { %v1374_v58 = vpop.eup %1373  ;;  %v470_v60 = vmul.f32 %v1372_v55, %v1620_v53  ;;  %v1340_v13 = vpop.f32.mrf.mxu1  ;;  %v408_v21 = vadd.f32 %v1324_v10, %v1602_v29  ;;  %1399 = vtanh.f32 %v403_v11 }
  0xdc   :  { %v1376_v61 = vpop.eup %1375  ;;  %v486_v62 = vmul.f32 %v1374_v58, %v1620_v53  ;;  %v424_v24 = vadd.f32 %v1340_v13, %v1605_v30  ;;  %v293_v25 = vpop.f32.mrf.mxu0  ;;  %1401 = vtanh.f32 %v419_v16 }
  0xdd   :  { %v1378_v63 = vpop.eup %1377  ;;  %v506_v1 = vsel %vm178_vm0, %v470_v60, 0.0  ;;  %v468_v2 = vmul.f32 %v1376_v61, %v1620_v53  ;;  %v357_v28 = vpop.f32.mrf.mxu1  ;;  %1403 = vtanh.f32 %v408_v21  ;;  %v406_v38 = vadd.f32 %v1602_v29, %v293_v25 }
  0xde   :  { %v1380_v3 = vpop.eup %1379  ;;  %507 = vadd.xlane.f32.xlu0 %v506_v1  ;;  %v554_v6 = vsel %vm178_vm0, %v486_v62, 0.0  ;;  %v484_v7 = vmul.f32 %v1378_v63, %v1620_v53  ;;  %1405 = vtanh.f32 %v424_v24  ;;  %v1325_v36 = vpop.f32.mrf.mxu0  ;;  %v422_v42 = vadd.f32 %v1605_v30, %v357_v28 }
  0xdf   :  { %v1382_v8 = vpop.eup %1381  ;;  %555 = vadd.xlane.f32.xlu1 %v554_v6  ;;  %v500_v12 = vsel %vm178_vm0, %v468_v2, 0.0  ;;  %v471_v14 = vmul.f32 %v1380_v3, %v1620_v53  ;;  %v1341_v39 = vpop.f32.mrf.mxu1  ;;  %1407 = vtanh.f32 %v406_v38  ;;  %v409_v48 = vadd.f32 %v1325_v36, %v1602_v29 }
  0xe0   :  { %v1384_v15 = vpop.eup %1383  ;;  %v548_v17 = vsel %vm178_vm0, %v484_v7, 0.0  ;;  %v487_v18 = vmul.f32 %v1382_v8, %v1620_v53  ;;  %v296_v46 = vpop.f32.mrf.mxu0  ;;  %1409 = vtanh.f32 %v422_v42  ;;  %v425_v52 = vadd.f32 %v1341_v39, %v1605_v30 }
  0xe1   :  { %v1386_v19 = vpop.eup %1385  ;;  %v509_v31 = vsel %vm178_vm0, %v471_v14, 0.0  ;;  %v469_v32 = vmul.f32 %v1384_v15, %v1620_v53  ;;  %v360_v49 = vpop.f32.mrf.mxu1  ;;  %1411 = vtanh.f32 %v409_v48  ;;  %v407_v58 = vadd.f32 %v1602_v29, %v296_v46 }
  0xe2   :  { %501 = vadd.xlane.f32.xlu0 %v500_v12  ;;  %v1388_v23 = vpop.eup %1387  ;;  %v557_v33 = vsel %vm178_vm0, %v487_v18, 0.0  ;;  %v485_v34 = vmul.f32 %v1386_v19, %v1620_v53  ;;  %v1328_v55 = vpop.f32.mrf.mxu0  ;;  %1413 = vtanh.f32 %v425_v52  ;;  %v423_v62 = vadd.f32 %v1605_v30, %v360_v49 }
  0xe3   :  { %549 = vadd.xlane.f32.xlu1 %v548_v17  ;;  %v1390_v26 = vpop.eup %1389  ;;  %v474_v35 = vmul.f32 %v1388_v23, %v1620_v53  ;;  %v503_v40 = vsel %vm178_vm0, %v469_v32, 0.0  ;;  %v1344_v57 = vpop.f32.mrf.mxu1  ;;  %v412_v3 = vadd.f32 %v1328_v55, %v1602_v29  ;;  %1415 = vtanh.f32 %v407_v58 }
  0xe4   :  { %v490_v37 = vmul.f32 %v1390_v26, %v1620_v53  ;;  %v1392_v41 = vpop.eup %1391  ;;  %v551_v43 = vsel %vm178_vm0, %v485_v34, 0.0  ;;  %v309_v0 = vpop.f32.mrf.mxu0  ;;  %v428_v6 = vadd.f32 %v1344_v57, %v1605_v30  ;;  %1417 = vtanh.f32 %v423_v62 }
  0xe5   :  { %v1394_v44 = vpop.eup %1393  ;;  %v518_v45 = vsel %vm178_vm0, %v474_v35, 0.0  ;;  %v472_v50 = vmul.f32 %v1392_v41, %v1620_v53  ;;  %v373_v4 = vpop.f32.mrf.mxu1  ;;  %1419 = vtanh.f32 %v412_v3  ;;  %v410_v16 = vadd.f32 %v1602_v29, %v309_v0 }
  0xe6   :  { %510 = vadd.xlane.f32.xlu0 %v509_v31  ;;  %v566_v47 = vsel %vm178_vm0, %v490_v37, 0.0  ;;  %v1396_v51 = vpop.eup %1395  ;;  %v488_v54 = vmul.f32 %v1394_v44, %v1620_v53  ;;  %v1329_v11 = vpop.f32.mrf.mxu0  ;;  %1421 = vtanh.f32 %v428_v6  ;;  %v426_v19 = vadd.f32 %v1605_v30, %v373_v4 }
  0xe7   :  { %558 = vadd.xlane.f32.xlu1 %v557_v33  ;;  %v1398_v56 = vpop.eup %1397  ;;  %v512_v59 = vsel %vm178_vm0, %v472_v50, 0.0  ;;  %v475_v60 = vmul.f32 %v1396_v51, %v1620_v53  ;;  %v1345_v13 = vpop.f32.mrf.mxu1  ;;  %1423 = vtanh.f32 %v410_v16  ;;  %v413_v37 = vadd.f32 %v1329_v11, %v1602_v29 }
  0xe8   :  { %v1400_v61 = vpop.eup %1399  ;;  %v560_v63 = vsel %vm178_vm0, %v488_v54, 0.0  ;;  %v491_v1 = vmul.f32 %v1398_v56, %v1620_v53  ;;  %v312_v21 = vpop.f32.mrf.mxu0  ;;  %1425 = vtanh.f32 %v426_v19  ;;  %v429_v41 = vadd.f32 %v1345_v13, %v1605_v30 }
  0xe9   :  { %v1402_v2 = vpop.eup %1401  ;;  %v521_v8 = vsel %vm178_vm0, %v475_v60, 0.0  ;;  %v473_v9 = vmul.f32 %v1400_v61, %v1620_v53  ;;  %v376_v25 = vpop.f32.mrf.mxu1  ;;  %v411_v31 = vadd.f32 %v1602_v29, %v312_v21  ;;  %v1713_v21 = vand.u32 127, %v38_v20 }
  0xea   :  { %504 = vadd.xlane.f32.xlu0 %v503_v40  ;;  %v1404_v5 = vpop.eup %1403  ;;  %v569_v10 = vsel %vm178_vm0, %v491_v1, 0.0  ;;  %v489_v12 = vmul.f32 %v1402_v2, %v1620_v53  ;;  %v427_v34 = vadd.f32 %v1605_v30, %v376_v25 }
  0xeb   :  { %552 = vadd.xlane.f32.xlu1 %v551_v43  ;;  %v1406_v7 = vpop.eup %1405  ;;  %v478_v14 = vmul.f32 %v1404_v5, %v1620_v53  ;;  %v515_v17 = vsel %vm178_vm0, %v473_v9, 0.0  ;;  %1427 = vtanh.f32 %v411_v31  ;;  %v641_v31 = vadd.s32 4294967280, %v1713_v21 }
  0xec   :  { %v494_v15 = vmul.f32 %v1406_v7, %v1620_v53  ;;  %v1408_v18 = vpop.eup %1407  ;;  %v563_v23 = vsel %vm178_vm0, %v489_v12, 0.0  ;;  %1429 = vtanh.f32 %v427_v34  ;;  %v648_v20 = vadd.s32 4294967272, %v1713_v21 }
  0xed   :  { %v1410_v24 = vpop.eup %1409  ;;  %v530_v26 = vsel %vm178_vm0, %v478_v14, 0.0  ;;  %v476_v32 = vmul.f32 %v1408_v18, %v1620_v53  ;;  %1431 = vtanh.f32 %v413_v37  ;;  %v662_v37 = vadd.s32 4294967256, %v1713_v21 }
  0xee   :  { %519 = vadd.xlane.f32.xlu0 %v518_v45  ;;  %v578_v28 = vsel %vm178_vm0, %v494_v15, 0.0  ;;  %v1412_v33 = vpop.eup %1411  ;;  %v492_v35 = vmul.f32 %v1410_v24, %v1620_v53  ;;  %1433 = vtanh.f32 %v429_v41  ;;  %v634_v24 = vadd.s32 4294967288, %v1713_v21 }
  0xef   :  { %567 = vadd.xlane.f32.xlu1 %v566_v47  ;;  %v1414_v36 = vpop.eup %1413  ;;  %v524_v38 = vsel %vm178_vm0, %v476_v32, 0.0  ;;  %v479_v39 = vmul.f32 %v1412_v33, %v1620_v53  ;;  %v632_v33 = vsub.s32 %v1713_v21, %v1592_v22 }
  0xf0   :  { %v1416_v40 = vpop.eup %1415  ;;  %v572_v42 = vsel %vm178_vm0, %v492_v35, 0.0  ;;  %v495_v43 = vmul.f32 %v1414_v36, %v1620_v53  ;;  %v655_v35 = vadd.s32 4294967264, %v1713_v21 }
  0xf1   :  { %v1418_v44 = vpop.eup %1417  ;;  %v533_v29 = vsel %vm178_vm0, %v479_v39, 0.0  ;;  %v477_v47 = vmul.f32 %v1416_v40, %v1620_v53 }
  0xf2   :  { %513 = vadd.xlane.f32.xlu0 %v512_v59  ;;  %v1420_v45 = vpop.eup %1419  ;;  %v581_v48 = vsel %vm178_vm0, %v495_v43, 0.0  ;;  %v493_v30 = vmul.f32 %v1418_v44, %v1620_v53  ;;  %v658_v44 = vsub.s32 %v655_v35, %v1592_v22 }
  0xf3   :  { %561 = vadd.xlane.f32.xlu1 %v560_v63  ;;  %v1422_v46 = vpop.eup %1421  ;;  %v482_v49 = vmul.f32 %v1420_v45, %v1620_v53  ;;  %v527_v51 = vsel %vm178_vm0, %v477_v47, 0.0  ;;  %v651_v45 = vsub.s32 %v648_v20, %v1592_v22 }
  0xf4   :  { %v498_v50 = vmul.f32 %v1422_v46, %v1620_v53  ;;  %v1424_v52 = vpop.eup %1423  ;;  %v575_v54 = vsel %vm178_vm0, %v493_v30, 0.0  ;;  %v669_v30 = vadd.s32 4294967248, %v1713_v21 }
  0xf5   :  { %v1426_v55 = vpop.eup %1425  ;;  %v542_v56 = vsel %vm178_vm0, %v482_v49, 0.0  ;;  %v480_v58 = vmul.f32 %v1424_v52, %v1620_v53 }
  0xf6   :  { %522 = vadd.xlane.f32.xlu0 %v521_v8  ;;  %v590_v57 = vsel %vm178_vm0, %v498_v50, 0.0  ;;  %v496_v60 = vmul.f32 %v1426_v55, %v1620_v53 }
  0xf7   :  { %570 = vadd.xlane.f32.xlu1 %v569_v10  ;;  %v536_v62 = vsel %vm178_vm0, %v480_v58, 0.0 }
  0xf8   :  { %v1428_v59 = vpop.eup %1427  ;;  %v584_v1 = vsel %vm178_vm0, %v496_v60, 0.0 }
  0xf9   :  { %v1430_v61 = vpop.eup %1429  ;;  %v481_v63 = vmul.f32 %v1428_v59, %v1620_v53 }
  0xfa   :  { %516 = vadd.xlane.f32.xlu0 %v515_v17  ;;  %v1432_v0 = vpop.eup %1431  ;;  %v497_v2 = vmul.f32 %v1430_v61, %v1620_v53 }
  0xfb   :  { %564 = vadd.xlane.f32.xlu1 %v563_v23  ;;  %v1434_v3 = vpop.eup %1433  ;;  %v539_v4 = vsel %vm178_vm0, %v481_v63, 0.0  ;;  %v483_v5 = vmul.f32 %v1432_v0, %v1620_v53  ;;  %v672_v63 = vsub.s32 %v669_v30, %v1592_v22 }
  0xfc   :  { %v587_v6 = vsel %vm178_vm0, %v497_v2, 0.0  ;;  %v499_v7 = vmul.f32 %v1434_v3, %v1620_v53 }
  0xfd   :  { %v545_v8 = vsel %vm178_vm0, %v483_v5, 0.0 }
  0xfe   :  { %531 = vadd.xlane.f32.xlu0 %v530_v26  ;;  %v593_v9 = vsel %vm178_vm0, %v499_v7, 0.0 }
  0xff   :  { %579 = vadd.xlane.f32.xlu1 %v578_v28  ;;  %v637_v28 = vsub.s32 %v634_v24, %v1592_v22  ;;  %v711_v24 = vadd.s32 4294967200, %v1713_v21 }
 0x102   :  { %525 = vadd.xlane.f32.xlu0 %v524_v38  ;;  %v644_v38 = vsub.s32 %v641_v31, %v1592_v22 }
 0x103   :  { %573 = vadd.xlane.f32.xlu1 %v572_v42 }
 0x106   :  { %534 = vadd.xlane.f32.xlu0 %v533_v29  ;;  %v665_v29 = vsub.s32 %v662_v37, %v1592_v22  ;;  %v718_v37 = vadd.s32 4294967192, %v1713_v21 }
 0x107   :  { %582 = vadd.xlane.f32.xlu1 %v581_v48 }
 0x108   :  { %v721_v30 = vsub.s32 %v718_v37, %v1592_v22 }
 0x10a   :  { %528 = vadd.xlane.f32.xlu0 %v527_v51  ;;  %v676_v51 = vadd.s32 4294967240, %v1713_v21 }
 0x10b   :  { %576 = vadd.xlane.f32.xlu1 %v575_v54 }
 0x10e   :  { %543 = vadd.xlane.f32.xlu0 %v542_v56  ;;  %v683_v56 = vadd.s32 4294967232, %v1713_v21 }
 0x10f   :  { %591 = vadd.xlane.f32.xlu1 %v590_v57  ;;  %v690_v57 = vadd.s32 4294967224, %v1713_v21 }
 0x110   :  { %v686_v7 = vsub.s32 %v683_v56, %v1592_v22 }
 0x112   :  { %537 = vadd.xlane.f32.xlu0 %v536_v62 }
 0x113   :  { %585 = vadd.xlane.f32.xlu1 %v584_v1 }
 0x116   :  { %540 = vadd.xlane.f32.xlu0 %v539_v4 }
 0x117   :  { %588 = vadd.xlane.f32.xlu1 %v587_v6  ;;  %v679_v6 = vsub.s32 %v676_v51, %v1592_v22 }
 0x11a   :  { %546 = vadd.xlane.f32.xlu0 %v545_v8 }
 0x11b   :  { %594 = vadd.xlane.f32.xlu1 %v593_v9 }
 0x167   :  { %v508_v10 = vpop.xlane.xlu0 %507 }
 0x168   :  { %v556_v11 = vpop.xlane.xlu1 %555  ;;  %v645_v47 = vrot.slane %v508_v10, %v644_v38  ;;  %v693_v10 = vsub.s32 %v690_v57, %v1592_v22 }
 0x169   :  { %v751_v50 = vrot.slane %v556_v11, %v644_v38 }
 0x16b   :  { %v502_v12 = vpop.xlane.xlu0 %501 }
 0x16c   :  { %v550_v13 = vpop.xlane.xlu1 %549  ;;  %v633_v41 = vrot.slane %v502_v12, %v632_v33 }
 0x16d   :  { %v742_v43 = vrot.slane %v550_v13, %v632_v33  ;;  %v697_v13 = vadd.s32 4294967216, %v1713_v21 }
 0x16f   :  { %v511_v14 = vpop.xlane.xlu0 %510 }
 0x170   :  { %v559_v15 = vpop.xlane.xlu1 %558  ;;  %v652_v58 = vrot.slane %v511_v14, %v651_v45 }
 0x171   :  { %v756_v62 = vrot.slane %v559_v15, %v651_v45 }
 0x173   :  { %v505_v16 = vpop.xlane.xlu0 %504 }
 0x174   :  { %v553_v17 = vpop.xlane.xlu1 %552  ;;  %v638_v36 = vrot.slane %v505_v16, %v637_v28 }
 0x175   :  { %v746_v39 = vrot.slane %v553_v17, %v637_v28 }
 0x176   :  { %v640_v46 = vsel %vm639_vm1, %v638_v36, %v633_v41 }
 0x177   :  { %v1708_v18 = vpop.xlane.xlu0 %519  ;;  %v747_v48 = vsel %vm639_vm1, %v746_v39, %v742_v43  ;;  %v647_v54 = vsel %vm646_vm2, %v645_v47, %v640_v46  ;;  %v714_v39 = vsub.s32 %v711_v24, %v1592_v22  ;;  %v725_v46 = vadd.s32 4294967184, %v1713_v21 }
 0x178   :  { %v1710_v19 = vpop.xlane.xlu1 %567  ;;  %v752_v59 = vsel %vm646_vm2, %v751_v50, %v747_v48  ;;  %v654_v2 = vsel %vm653_vm3, %v652_v58, %v647_v54  ;;  %v673_v11 = vrot.slane %v1708_v18, %v672_v63  ;;  %vm818_vm1 = vcmask 1041409  }
 0x179   :  { %v757_v5 = vsel %vm653_vm3, %v756_v62, %v752_v59  ;;  %v771_v15 = vrot.slane %v1710_v19, %v672_v63  ;;  %v700_v19 = vsub.s32 %v697_v13, %v1592_v22  ;;  %v728_v56 = vsub.s32 %v725_v46, %v1592_v22 }
 0x17a   :  { %vm823_vm2 = vcmask 1041408  }
 0x17b   :  { %v514_v53 = vpop.xlane.xlu0 %513 }
 0x17c   :  { %v562_v23 = vpop.xlane.xlu1 %561  ;;  %v659_v55 = vrot.slane %v514_v53, %v658_v44 }
 0x17d   :  { %v761_v60 = vrot.slane %v562_v23, %v658_v44  ;;  %v704_v23 = vadd.s32 4294967208, %v1713_v21 }
 0x17e   :  { %v661_v4 = vsel %vm660_vm4, %v659_v55, %v654_v2 }
 0x17f   :  { %v1716_v25 = vpop.xlane.xlu0 %522  ;;  %v762_v8 = vsel %vm660_vm4, %v761_v60, %v757_v5 }
 0x180   :  { %v1718_v26 = vpop.xlane.xlu1 %570  ;;  %v680_v28 = vrot.slane %v1716_v25, %v679_v6 }
 0x181   :  { %v776_v33 = vrot.slane %v1718_v26, %v679_v6  ;;  %v707_v26 = vsub.s32 %v704_v23, %v1592_v22 }
 0x183   :  { %v517_v32 = vpop.xlane.xlu0 %516 }
 0x184   :  { %v565_v34 = vpop.xlane.xlu1 %564  ;;  %v666_v61 = vrot.slane %v517_v32, %v665_v29 }
 0x185   :  { %v766_v0 = vrot.slane %v565_v34, %v665_v29 }
 0x186   :  { %v668_v9 = vsel %vm667_vm5, %v666_v61, %v661_v4 }
 0x187   :  { %v1728_v40 = vpop.xlane.xlu0 %531  ;;  %v767_v12 = vsel %vm667_vm5, %v766_v0, %v762_v8  ;;  %v675_v17 = vsel %vm674_vm6, %v673_v11, %v668_v9 }
 0x188   :  { %v1730_v42 = vpop.xlane.xlu1 %579  ;;  %v772_v18 = vsel %vm674_vm6, %v771_v15, %v767_v12  ;;  %v682_v20 = vsel %vm681_vm7, %v680_v28, %v675_v17  ;;  %v701_v44 = vrot.slane %v1728_v40, %v700_v19 }
 0x189   :  { %v777_v25 = vsel %vm681_vm7, %v776_v33, %v772_v18  ;;  %v791_v47 = vrot.slane %v1730_v42, %v700_v19  ;;  %v972_v19 = vsub.s32 1, %v1592_v22 }
 0x18b   :  { %v526_v49 = vpop.xlane.xlu0 %525 }
 0x18c   :  { %v574_v52 = vpop.xlane.xlu1 %573  ;;  %v687_v53 = vrot.slane %v526_v49, %v686_v7  ;;  %v732_v49 = vadd.s32 4294967176, %v1713_v21 }
 0x18d   :  { %v781_v31 = vrot.slane %v574_v52, %v686_v7 }
 0x18e   :  { %v689_v38 = vsel %vm688_vm8, %v687_v53, %v682_v20  ;;  %v735_v60 = vsub.s32 %v732_v49, %v1592_v22  ;;  %v830_v53 = vld [vmem:[%s1880_s2] sm:$0x3]  ;;  %s1484_s2 = smov [#allocation5]  }
 0x18f   :  { %v1742_v1 = vpop.xlane.xlu0 %534  ;;  %v782_v41 = vsel %vm688_vm8, %v781_v31, %v777_v25  ;;  %s1165_s11 = sshll.u32 %s1484_s2, 4  ;;  %s1166_s11 = int_to_ptr.vmem [resolvable:$true] %s1165_s11 }
 0x190   :  { %v1745_v3 = vpop.xlane.xlu1 %582  ;;  %v708_v52 = vrot.slane %v1742_v1, %v707_v26  ;;  %s1439_s12 = scalar_lea.vmem %s1166_s11, 32  ;;  %p1444_p1 = scmp.lt.s32.totalorder %s1166_s11, %s1166_s11 }
 0x191   :  { %v796_v40 = vrot.slane %v1745_v3, %v707_v26  ;;  %p1440_p0 = scmp.ne.s32.totalorder %s1166_s11, %s1439_s12  ;;  %p1445_p2 = scmp.lt.s32.totalorder %s1439_s12, %s1439_s12 }
 0x193   :  { %v529_v14 = vpop.xlane.xlu0 %528  ;;  %p1446_p3 = por %p1445_p2, %p1444_p1 }
 0x194   :  { %v577_v16 = vpop.xlane.xlu1 %576  ;;  %v694_v32 = vrot.slane %v529_v14, %v693_v10 }
 0x195   :  { %v786_v34 = vrot.slane %v577_v16, %v693_v10  ;;  %p1447_p4 = pnand %p1446_p3, %p1440_p0 }
 0x196   :  { %v696_v43 = vsel %vm695_vm9, %v694_v32, %v689_v38 }
 0x197   :  { %v544_v35 = vpop.xlane.xlu0 %543  ;;  %v787_v45 = vsel %vm695_vm9, %v786_v34, %v782_v41  ;;  %v703_v50 = vsel %vm702_vm10, %v701_v44, %v696_v43 }
 0x198   :  { %v592_v36 = vpop.xlane.xlu1 %591  ;;  %v792_v54 = vsel %vm702_vm10, %v791_v47, %v787_v45  ;;  %v710_v42 = vsel %vm709_vm11, %v708_v52, %v703_v50  ;;  %v729_v1 = vrot.slane %v544_v35, %v728_v56 }
 0x199   :  { %v797_v61 = vsel %vm709_vm11, %v796_v40, %v792_v54  ;;  %v811_v3 = vrot.slane %v592_v36, %v728_v56 }
 0x19b   :  { %v538_v29 = vpop.xlane.xlu0 %537 }
 0x19c   :  { %v586_v48 = vpop.xlane.xlu1 %585  ;;  %v715_v51 = vrot.slane %v538_v29, %v714_v39 }
 0x19d   :  { %v801_v55 = vrot.slane %v586_v48, %v714_v39 }
 0x19e   :  { %v717_v21 = vsel %vm716_vm12, %v715_v51, %v710_v42 }
 0x19f   :  { %v541_v57 = vpop.xlane.xlu0 %540  ;;  %v802_v63 = vsel %vm716_vm12, %v801_v55, %v797_v61 }
 0x1a0   :  { %v722_v58 = vrot.slane %v541_v57, %v721_v30  ;;  %v589_v59 = vpop.xlane.xlu1 %588 }
 0x1a1   :  { %v806_v62 = vrot.slane %v589_v59, %v721_v30 }
 0x1a2   :  { %v724_v0 = vsel %vm723_vm13, %v722_v58, %v717_v21 }
 0x1a3   :  { %v807_v2 = vsel %vm723_vm13, %v806_v62, %v802_v63  ;;  %v547_v4 = vpop.xlane.xlu0 %546  ;;  %v731_v7 = vsel %vm730_vm14, %v729_v1, %v724_v0 }
 0x1a4   :  { %v736_v5 = vrot.slane %v547_v4, %v735_v60  ;;  %v595_v6 = vpop.xlane.xlu1 %594  ;;  %v812_v10 = vsel %vm730_vm14, %v811_v3, %v807_v2 }
 0x1a5   :  { %v816_v8 = vrot.slane %v595_v6, %v735_v60 }
 0x1a6   :  { %v738_v9 = vsel %vm737_vm15, %v736_v5, %v731_v7 }
 0x1a7   :  { %v817_v11 = vsel %vm737_vm15, %v816_v8, %v812_v10 }
 0x1a8   :  { %v819_v12 = vsel %vm818_vm1, %v817_v11, %v738_v9 }
 0x1a9   :  { %821 = vst [vmem:[#allocation2] sm:$0x3] %v819_v12 }
 0x1b0   :  { %v822_v13 = vld [vmem:[#allocation2] sm:$0x3] }
 0x1b1   :  { %v824_v14 = vsel %vm823_vm2, %v822_v13, -inf }
 0x1b2   :  { %825 = vmax.xlane.f32.xlu0 %v824_v14 }
 0x23b   :  { %v826_v15 = vpop.xlane.xlu0 %825 }
 0x23c   :  { %v827_v16 = vsub.f32 %v822_v13, %v826_v15 }
 0x23e   :  { %v828_v17 = vmul.f32 1.442695, %v827_v16 }
 0x240   :  { %1435 = vpow2.f32 %v828_v17 }
 0x24d   :  { %v1436_v23 = vpop.eup %1435 }
 0x24e   :  { %v831_v24 = vmul.f32 %v1436_v23, %v830_v53 }
 0x250   :  { %v832_v28 = vsel %vm823_vm2, %v831_v24, 0.0 }
 0x251   :  { %833 = vadd.xlane.f32.xlu1 %v832_v28 }
 0x2da   :  { %v834_v18 = vpop.xlane.xlu1 %833 }
 0x2db   :  { %1437 = vrcp.f32 %v834_v18 }
 0x2e8   :  { %v1438_v31 = vpop.eup %1437 }
 0x2e9   :  { %v836_v32 = vmul.f32 %v1438_v31, %v831_v24 }
 0x2eb   :  { %837 = vst [vmem:[#allocation5] sm:$0x3] %v836_v32 }
 0x2f2   :  { %v902_v33 = vld [vmem:[#allocation5] sm:$0x3] }
 0x2f3   :  { %v906_v34 = vrot.slane %v902_v33, %v1599_v27  ;;  %v973_v35 = vrot.slane %v902_v33, %v972_v19 }
 0x2f5   :  { %912 = vbcast.lane.b32.xlu1 %v906_v34, 264  ;;  %908 = vbcast.lane.b32.xlu0 %v906_v34, 256 }
 0x2f9   :  { %975 = vbcast.lane.b32.xlu1 %v973_v35, 256  ;;  %916 = vbcast.lane.b32.xlu0 %v906_v34, 272 }
 0x2fd   :  { %979 = vbcast.lane.b32.xlu1 %v973_v35, 264  ;;  %920 = vbcast.lane.b32.xlu0 %v906_v34, 280 }
 0x301   :  { %983 = vbcast.lane.b32.xlu1 %v973_v35, 272  ;;  %924 = vbcast.lane.b32.xlu0 %v906_v34, 288 }
 0x305   :  { %987 = vbcast.lane.b32.xlu1 %v973_v35, 280  ;;  %928 = vbcast.lane.b32.xlu0 %v906_v34, 296 }
 0x309   :  { %991 = vbcast.lane.b32.xlu1 %v973_v35, 288  ;;  %932 = vbcast.lane.b32.xlu0 %v906_v34, 304 }
 0x30d   :  { %995 = vbcast.lane.b32.xlu1 %v973_v35, 296  ;;  %936 = vbcast.lane.b32.xlu0 %v906_v34, 312 }
 0x311   :  { %999 = vbcast.lane.b32.xlu1 %v973_v35, 304  ;;  %940 = vbcast.lane.b32.xlu0 %v906_v34, 320 }
 0x315   :  { %1003 = vbcast.lane.b32.xlu1 %v973_v35, 312  ;;  %944 = vbcast.lane.b32.xlu0 %v906_v34, 328 }
 0x319   :  { %1007 = vbcast.lane.b32.xlu1 %v973_v35, 320  ;;  %948 = vbcast.lane.b32.xlu0 %v906_v34, 336 }
 0x31d   :  { %1011 = vbcast.lane.b32.xlu1 %v973_v35, 328  ;;  %952 = vbcast.lane.b32.xlu0 %v906_v34, 344 }
 0x321   :  { %1015 = vbcast.lane.b32.xlu1 %v973_v35, 336  ;;  %956 = vbcast.lane.b32.xlu0 %v906_v34, 352 }
 0x325   :  { %1019 = vbcast.lane.b32.xlu1 %v973_v35, 344  ;;  %960 = vbcast.lane.b32.xlu0 %v906_v34, 360 }
 0x329   :  { %1023 = vbcast.lane.b32.xlu1 %v973_v35, 352  ;;  %964 = vbcast.lane.b32.xlu0 %v906_v34, 368 }
 0x32d   :  { %1027 = vbcast.lane.b32.xlu1 %v973_v35, 360  ;;  %968 = vbcast.lane.b32.xlu0 %v906_v34, 376 }
 0x331   :  { %1031 = vbcast.lane.b32.xlu1 %v973_v35, 368 }
 0x335   :  { %1035 = vbcast.lane.b32.xlu1 %v973_v35, 376 }
 0x336   :  { %1450 = shalt.err (!%p1447_p4)
}
 0x337   :  { %1168 = dma.vmem_to_hbm [thread:$0]  %s1166_s11, 32, %s1884_s6, [#allocation6]   ;;  %v1214_v43 = vld [vmem:[%s1878_s0] sm:$0xff]   ;;  %v1277_v44 = vld [vmem:[%s1878_s0 + $0x8] sm:$0xff]   ;;  %v1278_v30 = vld [vmem:[%s1878_s0 + $0x10] sm:$0xff]   ;;  %vm1147_vm3 = vcmask 254976  }
 0x338   :  { %v1216_v29 = vunpack.c.h.bf16 %v1214_v43  ;;  %v1215_v47 = vunpack.c.l.bf16 %v1214_v43  ;;  %v1219_v48 = vunpack.c.l.bf16 %v1277_v44  ;;  %v1220_v54 = vunpack.c.h.bf16 %v1277_v44  ;;  %v1284_v55 = vld [vmem:[%s1878_s0 + $0x40] sm:$0xff]   ;;  %v1285_v42 = vld [vmem:[%s1878_s0 + $0x48] sm:$0xff]   ;;  %v1279_v58 = vld [vmem:[%s1878_s0 + $0x18] sm:$0xff]  }
 0x339   :  { %v1223_v56 = vunpack.c.l.bf16 %v1278_v30  ;;  %v1248_v57 = vunpack.c.h.bf16 %v1284_v55  ;;  %v1224_v63 = vunpack.c.h.bf16 %v1278_v30  ;;  %v1247_v0 = vunpack.c.l.bf16 %v1284_v55  ;;  %v1286_v3 = vld [vmem:[%s1878_s0 + $0x50] sm:$0xff]   ;;  %v1280_v8 = vld [vmem:[%s1878_s0 + $0x20] sm:$0xff]   ;;  %v1287_v28 = vld [vmem:[%s1878_s0 + $0x58] sm:$0xff]  }
 0x33a   :  { %v1251_v2 = vunpack.c.l.bf16 %v1285_v42  ;;  %v1227_v5 = vunpack.c.l.bf16 %v1279_v58  ;;  %v1252_v7 = vunpack.c.h.bf16 %v1285_v42  ;;  %v1228_v14 = vunpack.c.h.bf16 %v1279_v58  ;;  %v1281_v31 = vld [vmem:[%s1878_s0 + $0x28] sm:$0xff]  }
 0x33b   :  { %v1255_v17 = vunpack.c.l.bf16 %v1286_v3  ;;  %v1231_v18 = vunpack.c.l.bf16 %v1280_v8  ;;  %v1256_v33 = vunpack.c.h.bf16 %v1286_v3  ;;  %v1232_v19 = vunpack.c.h.bf16 %v1280_v8 }
 0x33c   :  { %v1260_v30 = vunpack.c.h.bf16 %v1287_v28 }
 0x367   :  { %v913_v22 = vpop.permute.xlu1 %912  ;;  %v909_v27 = vpop.permute.xlu0 %908 }
 0x368   :  { %v1038_v51 = vmul.f32 %v1216_v29, %v913_v22  ;;  %v1037_v52 = vmul.f32 %v1215_v47, %v909_v27  ;;  %v1288_v29 = vld [vmem:[%s1878_s0 + $0x60] sm:$0xff]  }
 0x369   :  { %v1263_v42 = vunpack.c.l.bf16 %v1288_v29 }
 0x36a   :  { %v1070_v21 = vsel %vm178_vm0, %v1038_v51, 0.0  ;;  %v1069_v61 = vsel %vm178_vm0, %v1037_v52, 0.0  ;;  %v1236_v51 = vunpack.c.h.bf16 %v1281_v31 }
 0x36b   :  { %v976_v20 = vpop.permute.xlu1 %975  ;;  %v917_v36 = vpop.permute.xlu0 %916  ;;  %v1071_v6 = vadd.f32 %v1070_v21, %v1069_v61 }
 0x36c   :  { %v1039_v40 = vmul.f32 %v1219_v48, %v917_v36  ;;  %v1053_v15 = vmul.f32 %v1247_v0, %v976_v20 }
 0x36e   :  { %v1072_v1 = vsel %vm178_vm0, %v1039_v40, 0.0 }
 0x36f   :  { %v980_v37 = vpop.permute.xlu1 %979  ;;  %v921_v38 = vpop.permute.xlu0 %920  ;;  %v1073_v16 = vadd.f32 %v1072_v1, %v1071_v6  ;;  %v1264_v1 = vunpack.c.h.bf16 %v1288_v29 }
 0x370   :  { %v1040_v62 = vmul.f32 %v1220_v54, %v921_v38  ;;  %v1054_v11 = vmul.f32 %v1248_v57, %v980_v37  ;;  %v1106_v37 = vsel %vm178_vm0, %v1053_v15, 0.0 }
 0x372   :  { %v1074_v12 = vsel %vm178_vm0, %v1040_v62, 0.0  ;;  %v1107_v22 = vsel %vm178_vm0, %v1054_v11, 0.0 }
 0x373   :  { %v984_v25 = vpop.permute.xlu1 %983  ;;  %v925_v39 = vpop.permute.xlu0 %924  ;;  %v1075_v32 = vadd.f32 %v1074_v12, %v1073_v16  ;;  %v1108_v47 = vadd.f32 %v1107_v22, %v1106_v37 }
 0x374   :  { %v1041_v4 = vmul.f32 %v1223_v56, %v925_v39  ;;  %v1055_v53 = vmul.f32 %v1251_v2, %v984_v25  ;;  %v1259_v25 = vunpack.c.l.bf16 %v1287_v28  ;;  %v1235_v39 = vunpack.c.l.bf16 %v1281_v31  ;;  %v1290_v28 = vld [vmem:[%s1878_s0 + $0x70] sm:$0xff]  }
 0x376   :  { %v1076_v23 = vsel %vm178_vm0, %v1041_v4, 0.0 }
 0x377   :  { %v988_v41 = vpop.permute.xlu1 %987  ;;  %v929_v26 = vpop.permute.xlu0 %928  ;;  %v1077_v38 = vadd.f32 %v1076_v23, %v1075_v32 }
 0x378   :  { %v1042_v13 = vmul.f32 %v1224_v63, %v929_v26  ;;  %v1056_v27 = vmul.f32 %v1252_v7, %v988_v41  ;;  %v1109_v26 = vsel %vm178_vm0, %v1055_v53, 0.0  ;;  %v1282_v41 = vld [vmem:[%s1878_s0 + $0x30] sm:$0xff]   ;;  %v1289_v63 = vld [vmem:[%s1878_s0 + $0x68] sm:$0xff]  }
 0x379   :  { %v1110_v56 = vadd.f32 %v1109_v26, %v1108_v47  ;;  %v1239_v58 = vunpack.c.l.bf16 %v1282_v41  ;;  %v1240_v3 = vunpack.c.h.bf16 %v1282_v41  ;;  %v1267_v12 = vunpack.c.l.bf16 %v1289_v63 }
 0x37a   :  { %v1078_v20 = vsel %vm178_vm0, %v1042_v13, 0.0  ;;  %v1111_v54 = vsel %vm178_vm0, %v1056_v27, 0.0  ;;  %v1268_v23 = vunpack.c.h.bf16 %v1289_v63  ;;  %v1272_v26 = vunpack.c.h.bf16 %v1290_v28 }
 0x37b   :  { %v992_v45 = vpop.permute.xlu1 %991  ;;  %v933_v46 = vpop.permute.xlu0 %932  ;;  %v1079_v48 = vadd.f32 %v1078_v20, %v1077_v38  ;;  %v1112_v0 = vadd.f32 %v1111_v54, %v1110_v56 }
 0x37c   :  { %v1043_v24 = vmul.f32 %v1227_v5, %v933_v46  ;;  %v1057_v43 = vmul.f32 %v1255_v17, %v992_v45 }
 0x37e   :  { %v1080_v44 = vsel %vm178_vm0, %v1043_v24, 0.0 }
 0x37f   :  { %v1797_v49 = vpop.permute.xlu1 %995  ;;  %v937_v50 = vpop.permute.xlu0 %936  ;;  %v1081_v57 = vadd.f32 %v1080_v44, %v1079_v48 }
 0x380   :  { %v1044_v36 = vmul.f32 %v1228_v14, %v937_v50  ;;  %v1058_v45 = vmul.f32 %v1256_v33, %v1797_v49 }
 0x382   :  { %v1082_v55 = vsel %vm178_vm0, %v1044_v36, 0.0  ;;  %v1115_v5 = vsel %vm178_vm0, %v1058_v45, 0.0  ;;  %v1271_v36 = vunpack.c.l.bf16 %v1290_v28 }
 0x383   :  { %v1808_v59 = vpop.permute.xlu1 %999  ;;  %v941_v60 = vpop.permute.xlu0 %940  ;;  %v1083_v49 = vadd.f32 %v1082_v55, %v1081_v57 }
 0x384   :  { %v1045_v46 = vmul.f32 %v1231_v18, %v941_v60  ;;  %v1113_v60 = vsel %vm178_vm0, %v1057_v43, 0.0  ;;  %v1059_v21 = vmul.f32 %v1259_v25, %v1808_v59  ;;  %v1283_v59 = vld [vmem:[%s1878_s0 + $0x38] sm:$0xff]  }
 0x385   :  { %v1243_v18 = vunpack.c.l.bf16 %v1283_v59  ;;  %v1244_v43 = vunpack.c.h.bf16 %v1283_v59 }
 0x386   :  { %v1084_v61 = vsel %vm178_vm0, %v1045_v46, 0.0  ;;  %v1117_v13 = vsel %vm178_vm0, %v1059_v21, 0.0 }
 0x387   :  { %v1004_v9 = vpop.permute.xlu1 %1003  ;;  %v945_v10 = vpop.permute.xlu0 %944  ;;  %v1085_v11 = vadd.f32 %v1084_v61, %v1083_v49 }
 0x388   :  { %v1046_v40 = vmul.f32 %v1232_v19, %v945_v10  ;;  %v1060_v6 = vmul.f32 %v1260_v30, %v1004_v9  ;;  %v1114_v10 = vadd.f32 %v1113_v60, %v1112_v0  ;;  %v1291_v30 = vld [vmem:[%s1878_s0 + $0x78] sm:$0xff]   ;;  %s1485_s0 = smov [#allocation3]  }
 0x389   :  { %s1155_s18 = sshll.u32 %s1485_s0, 4  ;;  %s1156_s18 = int_to_ptr.vmem [resolvable:$true] %s1155_s18 }
 0x38a   :  { %v1086_v7 = vsel %vm178_vm0, %v1046_v40, 0.0  ;;  %v1116_v17 = vadd.f32 %v1115_v5, %v1114_v10  ;;  %v1119_v31 = vsel %vm178_vm0, %v1060_v6, 0.0  ;;  %s1459_s6 = scalar_lea.vmem %s1156_s18, 32  ;;  %p1464_p6 = scmp.lt.s32.totalorder %s1156_s18, %s1156_s18 }
 0x38b   :  { %v1008_v34 = vpop.permute.xlu1 %1007  ;;  %v949_v35 = vpop.permute.xlu0 %948  ;;  %v1087_v53 = vadd.f32 %v1086_v7, %v1085_v11  ;;  %p1460_p5 = scmp.ne.s32.totalorder %s1156_s18, %s1459_s6  ;;  %p1465_p7 = scmp.lt.s32.totalorder %s1459_s6, %s1459_s6 }
 0x38c   :  { %v1047_v62 = vmul.f32 %v1235_v39, %v949_v35  ;;  %v1061_v14 = vmul.f32 %v1263_v42, %v1008_v34  ;;  %v1118_v34 = vadd.f32 %v1117_v13, %v1116_v17 }
 0x38d   :  { %p1466_p8 = por %p1465_p7, %p1464_p6 }
 0x38e   :  { %v1088_v15 = vsel %vm178_vm0, %v1047_v62, 0.0  ;;  %v1121_v22 = vsel %vm178_vm0, %v1061_v14, 0.0  ;;  %v1120_v37 = vadd.f32 %v1119_v31, %v1118_v34 }
 0x38f   :  { %v1012_v50 = vpop.permute.xlu1 %1011  ;;  %v953_v52 = vpop.permute.xlu0 %952  ;;  %v1089_v35 = vadd.f32 %v1088_v15, %v1087_v53  ;;  %p1467_p9 = pnand %p1466_p8, %p1460_p5 }
 0x390   :  { %v1048_v8 = vmul.f32 %v1236_v51, %v953_v52  ;;  %v1062_v32 = vmul.f32 %v1264_v1, %v1012_v50  ;;  %v1122_v47 = vadd.f32 %v1121_v22, %v1120_v37 }
 0x392   :  { %v1090_v33 = vsel %vm178_vm0, %v1048_v8, 0.0  ;;  %v1123_v44 = vsel %vm178_vm0, %v1062_v32, 0.0 }
 0x393   :  { %v1016_v2 = vpop.permute.xlu1 %1015  ;;  %v957_v4 = vpop.permute.xlu0 %956  ;;  %v1091_v38 = vadd.f32 %v1090_v33, %v1089_v35  ;;  %v1124_v54 = vadd.f32 %v1123_v44, %v1122_v47 }
 0x394   :  { %v1049_v16 = vmul.f32 %v1239_v58, %v957_v4  ;;  %v1063_v27 = vmul.f32 %v1267_v12, %v1016_v2  ;;  %v1275_v58 = vunpack.c.l.bf16 %v1291_v30  ;;  %v1276_v4 = vunpack.c.h.bf16 %v1291_v30 }
 0x396   :  { %v1092_v20 = vsel %vm178_vm0, %v1049_v16, 0.0  ;;  %v1125_v50 = vsel %vm178_vm0, %v1063_v27, 0.0 }
 0x397   :  { %v1020_v9 = vpop.permute.xlu1 %1019  ;;  %v961_v24 = vpop.permute.xlu0 %960  ;;  %v1093_v48 = vadd.f32 %v1092_v20, %v1091_v38  ;;  %v1126_v60 = vadd.f32 %v1125_v50, %v1124_v54 }
 0x398   :  { %v1050_v19 = vmul.f32 %v1240_v3, %v961_v24  ;;  %v1064_v46 = vmul.f32 %v1268_v23, %v1020_v9 }
 0x39a   :  { %v1094_v29 = vsel %vm178_vm0, %v1050_v19, 0.0  ;;  %v1127_v56 = vsel %vm178_vm0, %v1064_v46, 0.0 }
 0x39b   :  { %v1024_v25 = vpop.permute.xlu1 %1023  ;;  %v965_v39 = vpop.permute.xlu0 %964  ;;  %v1095_v45 = vadd.f32 %v1094_v29, %v1093_v48  ;;  %v1128_v63 = vadd.f32 %v1127_v56, %v1126_v60 }
 0x39c   :  { %v1051_v41 = vmul.f32 %v1243_v18, %v965_v39  ;;  %v1065_v51 = vmul.f32 %v1271_v36, %v1024_v25 }
 0x39e   :  { %v1096_v52 = vsel %vm178_vm0, %v1051_v41, 0.0  ;;  %v1129_v61 = vsel %vm178_vm0, %v1065_v51, 0.0 }
 0x39f   :  { %v1028_v55 = vpop.permute.xlu1 %1027  ;;  %v969_v40 = vpop.permute.xlu0 %968  ;;  %v1097_v21 = vadd.f32 %v1096_v52, %v1095_v45  ;;  %v1130_v3 = vadd.f32 %v1129_v61, %v1128_v63 }
 0x3a0   :  { %v1066_v57 = vmul.f32 %v1272_v26, %v1028_v55  ;;  %v1052_v42 = vmul.f32 %v1244_v43, %v969_v40 }
 0x3a2   :  { %v1098_v62 = vsel %vm178_vm0, %v1052_v42, 0.0  ;;  %v1131_v1 = vsel %vm178_vm0, %v1066_v57, 0.0 }
 0x3a3   :  { %v1099_v0 = vadd.f32 %v1098_v62, %v1097_v21  ;;  %v1032_v49 = vpop.permute.xlu1 %1031  ;;  %v1132_v7 = vadd.f32 %v1131_v1, %v1130_v3 }
 0x3a4   :  { %v1067_v2 = vmul.f32 %v1275_v58, %v1032_v49 }
 0x3a5   :  { %v1100_v5 = vrot.slane %v1099_v0, 4 }
 0x3a6   :  { %v1133_v6 = vsel %vm178_vm0, %v1067_v2, 0.0 }
 0x3a7   :  { %v1101_v8 = vadd.f32 %v1100_v5, %v1099_v0  ;;  %v1036_v59 = vpop.permute.xlu1 %1035  ;;  %v1134_v11 = vadd.f32 %v1133_v6, %v1132_v7 }
 0x3a8   :  { %v1068_v10 = vmul.f32 %v1276_v4, %v1036_v59 }
 0x3a9   :  { %v1102_v13 = vrot.slane %v1101_v8, 2 }
 0x3aa   :  { %v1135_v12 = vsel %vm178_vm0, %v1068_v10, 0.0 }
 0x3ab   :  { %v1136_v14 = vadd.f32 %v1135_v12, %v1134_v11  ;;  %v1103_v16 = vadd.f32 %v1102_v13, %v1101_v8 }
 0x3ad   :  { %v1137_v15 = vrot.slane %v1136_v14, 4  ;;  %v1104_v9 = vrot.slane %v1103_v16, 1 }
 0x3af   :  { %v1138_v17 = vadd.f32 %v1137_v15, %v1136_v14  ;;  %v1105_v28 = vadd.f32 %v1104_v9, %v1103_v16 }
 0x3b1   :  { %v1139_v53 = vrot.slane %v1138_v17, 2 }
 0x3b3   :  { %v1140_v23 = vadd.f32 %v1139_v53, %v1138_v17 }
 0x3b5   :  { %v1141_v24 = vrot.slane %v1140_v23, 1 }
 0x3b7   :  { %v1142_v18 = vadd.f32 %v1141_v24, %v1140_v23 }
 0x3b9   :  { %v1145_v31 = vsel %vm818_vm1, %v1142_v18, %v1105_v28 }
 0x3ba   :  { %1148 = vst.msk [vmem:[#allocation3] sm:$0x3] %vm1147_vm3, %v1145_v31 }
 0x3bb   :  { %1470 = shalt.err (!%p1467_p9)
}
 0x3bc   :  { %1158 = dma.vmem_to_hbm [thread:$0]  %s1156_s18, 32, %s1883_s5, [#allocation4]  }
 0x3bd   :  { %1479 = dma.done.wait [#allocation4], 32  }
 0x3be   :  { %1480 = vsyncadd [#allocation4], 4294967264 }
 0x3bf   :  { %1481 = dma.done.wait [#allocation6], 32  }
 0x3c0   :  { %1482 = vsyncadd [#allocation6], 4294967264 }
 0x3c1   :  { %1175 = vsyncpa [#allocation4], 1 }
 0x3c2   :  { %1176 = vsyncpa [#allocation6], 1 }

</bundles_post_ra>
